<compile_context>
chip_gen: v6e
topology: v6e:2x2x1
jax: 0.10.0
libtpu: 0.0.40
codegen_flags: <defaults>
</compile_context>

<pallas_src>
import functools

import jax
import jax.numpy as jnp
from jax import lax
from jax.experimental import pallas as pl
from jax.experimental.pallas import tpu as pltpu


def _round_up(n, m):
    return ((n + m - 1) // m) * m


def _mpo_critic_kernel(x_ref, w1_ref, b1_ref, w2_ref, b2_ref, w3t_ref, b3_ref,
                       o_ref):
    """Fused 3-layer MLP tile: relu(x@W1+b1) -> relu(.@W2+b2) -> W3t·(.)^T + b3."""
    cdt = w1_ref.dtype
    x = x_ref[...].astype(cdt)                                     # (TB, D) bf16
    h1 = jnp.dot(x, w1_ref[...],
                 preferred_element_type=jnp.float32) + b1_ref[...]
    h1 = jnp.maximum(h1, 0.0).astype(cdt)                          # (TB, 256)
    h2 = jnp.dot(h1, w2_ref[...],
                 preferred_element_type=jnp.float32) + b2_ref[...]
    h2 = jnp.maximum(h2, 0.0).astype(cdt)                          # (TB, 256)
    # Layer 3 as an NT matmul: (1, 256) x (TB, 256) contracting last dims
    # -> (1, TB).  Keeps the output store lane-dense (unmasked 128-lane vst)
    # instead of width-1 masked partial stores.
    out = lax.dot_general(w3t_ref[...], h2,
                          dimension_numbers=(((1,), (1,)), ((), ())),
                          preferred_element_type=jnp.float32)      # (1, TB) f32
    o_ref[...] = out + b3_ref[0]


def init_mpo_critic_params(key, obs_dim, h1=256, h2=256):
    """PyTorch nn.Linear default init (U[-1/sqrt(fan_in), 1/sqrt(fan_in)]).

    Weights stored as (in_features, out_features) so y = x @ W + b.
    """
    keys = jax.random.split(key, 6)

    def linear(kw, kb, fan_in, fan_out):
        bound = 1.0 / float(fan_in) ** 0.5
        w = jax.random.uniform(kw, (fan_in, fan_out), jnp.float32, -bound, bound)
        b = jax.random.uniform(kb, (fan_out,), jnp.float32, -bound, bound)
        return w, b

    w1, b1 = linear(keys[0], keys[1], obs_dim, h1)
    w2, b2 = linear(keys[2], keys[3], h1, h2)
    w3, b3 = linear(keys[4], keys[5], h2, 1)
    return dict(w1=w1, b1=b1, w2=w2, b2=b2, w3=w3, b3=b3)


def prepare_mpo_critic_params(params, compute_dtype=jnp.bfloat16):
    """One-time weight prep, hoisted off the per-call hot path.

    Weights -> compute_dtype (bf16 halves weight DMA / doubles MXU rate);
    biases stay f32 (added into the f32 MXU accumulator); w3 is transposed to
    (1, 256) so the final layer emits a lane-dense (1, TB) row.
    NOTE: bf16 compute loses a little input precision vs a pure-f32 PyTorch
    forward — acceptable for a critic head.
    """
    cdt = compute_dtype
    return dict(
        w1=params["w1"].astype(cdt),                          # (obs_dim, 256)
        b1=params["b1"].reshape(1, -1).astype(jnp.float32),   # (1, 256)
        w2=params["w2"].astype(cdt),                          # (256, 256)
        b2=params["b2"].reshape(1, -1).astype(jnp.float32),   # (1, 256)
        w3t=params["w3"].T.astype(cdt),                       # (1, 256)
        b3=params["b3"].reshape(1).astype(jnp.float32),       # (1,) scalar, SMEM
    )


def _choose_tiling(batch, block_b):
    """Pick (batch tile TB, number of grid steps)."""
    if batch < 256:
        # Single tile: block dims equal the full array dims (always legal).
        return batch, 1
    # Multi-tile: TB must be a multiple of 128 so the (1, TB) output block is
    # lane-dense; target >= 2 grid steps so v7x can use both TensorCores.
    block_b = max(128, (int(block_b) // 128) * 128)
    half = _round_up((batch + 1) // 2, 128)
    tb = min(block_b, half)
    return tb, pl.cdiv(batch, tb)


@functools.partial(jax.jit, static_argnames=("block_b",))
def mpo_critic_forward(prepared, x, *, block_b=512):
    """Equivalent of MPOCritic.forward(x) -> (B, 1)."""
    B, d_in = x.shape
    H1 = prepared["w1"].shape[1]
    H2 = prepared["w2"].shape[1]
    TB, steps = _choose_tiling(B, block_b)

    w_itemsize = jnp.dtype(prepared["w1"].dtype).itemsize
    cost = pl.CostEstimate(
        flops=2 * B * (d_in * H1 + H1 * H2 + H2 * 1),
        transcendentals=0,
        bytes_accessed=(B * d_in * jnp.dtype(x.dtype).itemsize
                        + (d_in * H1 + H1 * H2 + H2) * w_itemsize
                        + (H1 + H2 + 1) * 4
                        + B * 4),
    )

    out = pl.pallas_call(
        _mpo_critic_kernel,
        out_shape=jax.ShapeDtypeStruct((1, B), jnp.float32),
        grid=(steps,),
        in_specs=[
            pl.BlockSpec((TB, d_in), lambda i: (i, 0)),   # x: streamed per tile
            pl.BlockSpec((d_in, H1), lambda i: (0, 0)),   # weights: VMEM-resident
            pl.BlockSpec((1, H1), lambda i: (0, 0)),
            pl.BlockSpec((H1, H2), lambda i: (0, 0)),
            pl.BlockSpec((1, H2), lambda i: (0, 0)),
            pl.BlockSpec((1, H2), lambda i: (0, 0)),      # w3^T
            pl.BlockSpec(memory_space=pltpu.MemorySpace.SMEM),  # b3 scalar
        ],
        out_specs=pl.BlockSpec((1, TB), lambda i: (0, i)),
        compiler_params=pltpu.CompilerParams(
            dimension_semantics=("parallel",),   # batch split over v7x's 2 TCs
            vmem_limit_bytes=32 << 20,
        ),
        cost_estimate=cost,
    )(x, prepared["w1"], prepared["b1"], prepared["w2"], prepared["b2"],
      prepared["w3t"], prepared["b3"])

    return out.reshape(B, 1)   # contiguous (1,B) -> (B,1): metadata-only


def _reference_forward(params, x, compute_dtype=jnp.bfloat16):
    """Pure-JAX reference mirroring the kernel's bf16-compute / f32-accumulate."""
    cdt = compute_dtype
    h = jnp.dot(x.astype(cdt), params["w1"].astype(cdt),
                preferred_element_type=jnp.float32) + params["b1"]
    h = jnp.maximum(h, 0.0).astype(cdt)
    h = jnp.dot(h, params["w2"].astype(cdt),
                preferred_element_type=jnp.float32) + params["b2"]
    h = jnp.maximum(h, 0.0).astype(cdt)
    return jnp.dot(h, params["w3"].astype(cdt),
                   preferred_element_type=jnp.float32) + params["b3"]


if __name__ == "__main__":
    key = jax.random.PRNGKey(0)
    k_params, k1, k2, k3 = jax.random.split(key, 4)

    obs_dim = 16
    params = init_mpo_critic_params(k_params, obs_dim)
    prepared = prepare_mpo_critic_params(params)   # one-time, off the hot path

    # Small shape consistent with the module: batch=2, obs_dim=16 (single tile).
    x_small = jax.random.normal(k1, (2, obs_dim), jnp.float32)
    out_small = jax.block_until_ready(mpo_critic_forward(prepared, x_small))
    ref_small = _reference_forward(params, x_small)
    assert out_small.shape == (2, 1), out_small.shape
    assert jnp.allclose(out_small, ref_small, atol=2e-2, rtol=2e-2), (
        out_small, ref_small)

    # Larger batch: TB=256 -> even 2-step grid (both v7x TensorCores).
    x_big = jax.random.normal(k2, (512, obs_dim), jnp.float32)
    out_big = jax.block_until_ready(mpo_critic_forward(prepared, x_big))
    ref_big = _reference_forward(params, x_big)
    assert out_big.shape == (512, 1), out_big.shape
    assert jnp.allclose(out_big, ref_big, atol=2e-2, rtol=2e-2), "big batch mismatch"

    # Ragged batch: exercises Pallas' masked partial last tile (B=300, TB=256).
    x_rag = jax.random.normal(k3, (300, obs_dim), jnp.float32)
    out_rag = jax.block_until_ready(mpo_critic_forward(prepared, x_rag))
    ref_rag = _reference_forward(params, x_rag)
    assert out_rag.shape == (300, 1), out_rag.shape
    assert jnp.allclose(out_rag, ref_rag, atol=2e-2, rtol=2e-2), "ragged batch mismatch"

    print("KERNEL_OK")
</pallas_src>

<mosaic_0001>
module attributes {stable_mosaic.version = 11 : i64} {
  func.func @_mpo_critic_kernel(%arg0: i32, %arg1: memref<2x16xf32, #tpu.memory_space<vmem>>, %arg2: memref<16x256xbf16, #tpu.memory_space<vmem>>, %arg3: memref<1x256xf32, #tpu.memory_space<vmem>>, %arg4: memref<256x256xbf16, #tpu.memory_space<vmem>>, %arg5: memref<1x256xf32, #tpu.memory_space<vmem>>, %arg6: memref<1x256xbf16, #tpu.memory_space<vmem>>, %arg7: memref<1xf32, #tpu.memory_space<smem>>, %arg8: memref<1x2xf32, #tpu.memory_space<vmem>>) attributes {dimension_semantics = [#tpu.dimension_semantics<parallel>], iteration_bounds = array<i64: 1>, scalar_prefetch = 0 : i64, scratch_operands = 0 : i64, tpu.core_type = #tpu.core_type<tc>, window_params = [{transform_indices = @transform_0, window_bounds = array<i64: 2, 16>}, {pipeline_mode = #tpu.pipeline_mode<synchronous>, transform_indices = @transform_1, window_bounds = array<i64: 16, 256>}, {pipeline_mode = #tpu.pipeline_mode<synchronous>, transform_indices = @transform_2, window_bounds = array<i64: 1, 256>}, {pipeline_mode = #tpu.pipeline_mode<synchronous>, transform_indices = @transform_3, window_bounds = array<i64: 256, 256>}, {pipeline_mode = #tpu.pipeline_mode<synchronous>, transform_indices = @transform_4, window_bounds = array<i64: 1, 256>}, {pipeline_mode = #tpu.pipeline_mode<synchronous>, transform_indices = @transform_5, window_bounds = array<i64: 1, 256>}, {transform_indices = @transform_6, window_bounds = array<i64: 1>}, {transform_indices = @transform_7, window_bounds = array<i64: 1, 2>}]} {
    %c0 = arith.constant 0 : index
    %c0_0 = arith.constant 0 : index
    %0 = vector.load %arg1[%c0, %c0_0] : memref<2x16xf32, #tpu.memory_space<vmem>>, vector<2x16xf32>
    %1 = arith.truncf %0 : vector<2x16xf32> to vector<2x16xbf16>
    %c0_1 = arith.constant 0 : index
    %c0_2 = arith.constant 0 : index
    %2 = vector.load %arg2[%c0_1, %c0_2] : memref<16x256xbf16, #tpu.memory_space<vmem>>, vector<16x256xbf16>
    %cst = arith.constant dense<0.000000e+00> : vector<2x256xf32>
    %3 = tpu.matmul %1, %2, %cst {dimension_numbers = #tpu.dot_dimension_numbers<[1], [0], [0], [1], [0, 0, 1, 1], [], []>} : vector<2x16xbf16>, vector<16x256xbf16>, vector<2x256xf32> -> vector<2x256xf32>
    %c0_3 = arith.constant 0 : index
    %c0_4 = arith.constant 0 : index
    %4 = vector.load %arg3[%c0_3, %c0_4] : memref<1x256xf32, #tpu.memory_space<vmem>>, vector<1x256xf32>
    %5 = vector.broadcast %4 : vector<1x256xf32> to vector<2x256xf32>
    %6 = arith.addf %3, %5 : vector<2x256xf32>
    %cst_5 = arith.constant 0.000000e+00 : f32
    %7 = vector.broadcast %cst_5 : f32 to vector<2x256xf32>
    %8 = arith.maximumf %6, %7 : vector<2x256xf32>
    %9 = arith.truncf %8 : vector<2x256xf32> to vector<2x256xbf16>
    %c0_6 = arith.constant 0 : index
    %c0_7 = arith.constant 0 : index
    %10 = vector.load %arg4[%c0_6, %c0_7] : memref<256x256xbf16, #tpu.memory_space<vmem>>, vector<256x256xbf16>
    %cst_8 = arith.constant dense<0.000000e+00> : vector<2x256xf32>
    %11 = tpu.matmul %9, %10, %cst_8 {dimension_numbers = #tpu.dot_dimension_numbers<[1], [0], [0], [1], [0, 0, 1, 1], [], []>} : vector<2x256xbf16>, vector<256x256xbf16>, vector<2x256xf32> -> vector<2x256xf32>
    %c0_9 = arith.constant 0 : index
    %c0_10 = arith.constant 0 : index
    %12 = vector.load %arg5[%c0_9, %c0_10] : memref<1x256xf32, #tpu.memory_space<vmem>>, vector<1x256xf32>
    %13 = vector.broadcast %12 : vector<1x256xf32> to vector<2x256xf32>
    %14 = arith.addf %11, %13 : vector<2x256xf32>
    %cst_11 = arith.constant 0.000000e+00 : f32
    %15 = vector.broadcast %cst_11 : f32 to vector<2x256xf32>
    %16 = arith.maximumf %14, %15 : vector<2x256xf32>
    %17 = arith.truncf %16 : vector<2x256xf32> to vector<2x256xbf16>
    %c0_12 = arith.constant 0 : index
    %c0_13 = arith.constant 0 : index
    %18 = vector.load %arg6[%c0_12, %c0_13] : memref<1x256xbf16, #tpu.memory_space<vmem>>, vector<1x256xbf16>
    %cst_14 = arith.constant dense<0.000000e+00> : vector<1x2xf32>
    %19 = tpu.matmul %18, %17, %cst_14 {dimension_numbers = #tpu.dot_dimension_numbers<[1], [1], [0], [0], [0, 0, 1, 0], [], []>} : vector<1x256xbf16>, vector<2x256xbf16>, vector<1x2xf32> -> vector<1x2xf32>
    %c0_15 = arith.constant 0 : index
    %20 = memref.load %arg7[%c0_15] : memref<1xf32, #tpu.memory_space<smem>>
    %21 = vector.broadcast %20 : f32 to vector<1x2xf32>
    %22 = arith.addf %19, %21 : vector<1x2xf32>
    %c0_16 = arith.constant 0 : index
    %c0_17 = arith.constant 0 : index
    %23 = vector.load %arg8[%c0_16, %c0_17] : memref<1x2xf32, #tpu.memory_space<vmem>>, vector<1x2xf32>
    tpu.vector_store %arg8[%c0_16, %c0_17], %22 {strides = array<i32>} : memref<1x2xf32, #tpu.memory_space<vmem>>, vector<1x2xf32>,
    return
  }
  func.func @transform_0(%arg0: i32) -> (i32, i32) {
    %c0_i32 = arith.constant 0 : i32
    %c0_i32_0 = arith.constant 0 : i32
    return %arg0, %c0_i32 : i32, i32
  }
  func.func @transform_1(%arg0: i32) -> (i32, i32) {
    %c0_i32 = arith.constant 0 : i32
    %c0_i32_0 = arith.constant 0 : i32
    %c0_i32_1 = arith.constant 0 : i32
    return %c0_i32, %c0_i32_0 : i32, i32
  }
  func.func @transform_2(%arg0: i32) -> (i32, i32) {
    %c0_i32 = arith.constant 0 : i32
    %c0_i32_0 = arith.constant 0 : i32
    %c0_i32_1 = arith.constant 0 : i32
    return %c0_i32, %c0_i32_0 : i32, i32
  }
  func.func @transform_3(%arg0: i32) -> (i32, i32) {
    %c0_i32 = arith.constant 0 : i32
    %c0_i32_0 = arith.constant 0 : i32
    %c0_i32_1 = arith.constant 0 : i32
    return %c0_i32, %c0_i32_0 : i32, i32
  }
  func.func @transform_4(%arg0: i32) -> (i32, i32) {
    %c0_i32 = arith.constant 0 : i32
    %c0_i32_0 = arith.constant 0 : i32
    %c0_i32_1 = arith.constant 0 : i32
    return %c0_i32, %c0_i32_0 : i32, i32
  }
  func.func @transform_5(%arg0: i32) -> (i32, i32) {
    %c0_i32 = arith.constant 0 : i32
    %c0_i32_0 = arith.constant 0 : i32
    %c0_i32_1 = arith.constant 0 : i32
    return %c0_i32, %c0_i32_0 : i32, i32
  }
  func.func @transform_6(%arg0: i32) -> i32 {
    %c0_i32 = arith.constant 0 : i32
    %c0_i32_0 = arith.constant 0 : i32
    return %c0_i32 : i32
  }
  func.func @transform_7(%arg0: i32) -> (i32, i32) {
    %c0_i32 = arith.constant 0 : i32
    %c0_i32_0 = arith.constant 0 : i32
    return %c0_i32, %arg0 : i32, i32
  }
}

</mosaic_0001>

<bundles_post_ra>
// kernel: mpo_critic_forward.1
= control target key start
LH: loop header
LB: loop body
LE: loop exit
PB: predicated region body
PF: predicated region fallthrough
CT: control target
= control target key end

     0   :  { %13 = vsyncpa [#allocation4], 0  ;;  %s768_s0 = inlined_call_operand.vmem [shape: f32[2,16], index: 0, kind: input, shape index: {}]   ;;  %s769_s1 = inlined_call_operand.hbm [shape: bf16[16,256], index: 1, kind: input, shape index: {}]   ;;  %s770_s2 = inlined_call_operand.hbm [shape: f32[1,256], index: 2, kind: input, shape index: {}]   ;;  %s771_s3 = inlined_call_operand.hbm [shape: bf16[256,256], index: 3, kind: input, shape index: {}]   ;;  %s772_s4 = inlined_call_operand.hbm [shape: f32[1,256], index: 4, kind: input, shape index: {}]   ;;  %s773_s5 = inlined_call_operand.vmem [shape: bf16[1,256], index: 5, kind: input, shape index: {}]   ;;  %s774_s6 = inlined_call_operand.<no memory space> [shape: f32[1], index: 6, kind: input, shape index: {}]   ;;  %s775_s7 = inlined_call_operand.hbm [shape: f32[1,2], index: 7, kind: output, shape index: {}]  }
   0x1   :  { %14 = vsyncpa [#allocation7], 0 }
   0x2   :  { %15 = vsyncpa [#allocation10], 0 }
   0x3   :  { %16 = vsyncpa [#allocation5], 0  ;;  %s695_s24 = smov [#allocation6]   ;;  %s696_s26 = smov [#allocation3]  }
   0x4   :  { %s37_s25 = sshll.u32 %s695_s24, 4  ;;  %s24_s27 = sshll.u32 %s696_s26, 4  ;;  %s38_s25 = int_to_ptr.vmem [resolvable:$true] %s37_s25  ;;  %s25_s27 = int_to_ptr.vmem [resolvable:$true] %s24_s27 }
   0x5   :  { %s595_s28 = scalar_lea.vmem %s38_s25, 32  ;;  %p600_p1 = scmp.lt.s32.totalorder %s38_s25, %s38_s25 }
   0x6   :  { %p596_p0 = scmp.ne.s32.totalorder %s38_s25, %s595_s28  ;;  %p601_p2 = scmp.lt.s32.totalorder %s595_s28, %s595_s28 }
   0x8   :  { %p602_p3 = por %p601_p2, %p600_p1 }
   0xa   :  { %p603_p4 = pnand %p602_p3, %p596_p0 }
   0xc   :  { %606 = shalt.err (!%p603_p4)
}
   0xd   :  { %40 = dma.hbm_to_vmem [thread:$0]  %s770_s2, 32, %s38_s25, [#allocation7]  }
   0xe   :  { %s615_s8 = scalar_lea.vmem %s25_s27, 256  ;;  %p620_p6 = scmp.lt.s32.totalorder %s25_s27, %s25_s27 }
   0xf   :  { %p616_p5 = scmp.ne.s32.totalorder %s25_s27, %s615_s8  ;;  %p621_p7 = scmp.lt.s32.totalorder %s615_s8, %s615_s8 }
  0x11   :  { %p622_p8 = por %p621_p7, %p620_p6 }
  0x13   :  { %p623_p9 = pnand %p622_p8, %p616_p5 }
  0x15   :  { %626 = shalt.err (!%p623_p9)
}
  0x16   :  { %s697_s9 = smov 128   ;;  %s698_s10 = smov 8  }
  0x17   :  { %30 = dma.hbm_to_vmem [thread:$0]  %s769_s1, 256, %s25_s27, [#allocation4], %s697_s9, %s697_s9, %s698_s10  }
  0x18   :  { %s699_s13 = smov [#allocation8]   ;;  %s700_s15 = smov [#allocation9]  }
  0x19   :  { %s46_s14 = sshll.u32 %s699_s13, 4  ;;  %s59_s16 = sshll.u32 %s700_s15, 4  ;;  %s47_s14 = int_to_ptr.vmem [resolvable:$true] %s46_s14  ;;  %s60_s16 = int_to_ptr.vmem [resolvable:$true] %s59_s16 }
  0x1a   :  { %s635_s2 = scalar_lea.vmem %s47_s14, 4096  ;;  %p640_p11 = scmp.lt.s32.totalorder %s47_s14, %s47_s14 }
  0x1b   :  { %p636_p10 = scmp.ne.s32.totalorder %s47_s14, %s635_s2  ;;  %p641_p12 = scmp.lt.s32.totalorder %s635_s2, %s635_s2 }
  0x1d   :  { %p642_p13 = por %p641_p12, %p640_p11 }
  0x1f   :  { %p643_p0 = pnand %p642_p13, %p636_p10 }
  0x21   :  { %646 = shalt.err (!%p643_p0)
}
  0x22   :  { %52 = dma.hbm_to_vmem [thread:$0]  %s771_s3, 4096, %s47_s14, [#allocation7], %s697_s9, %s697_s9, %s698_s10  }
  0x23   :  { %s655_s19 = scalar_lea.vmem %s60_s16, 32  ;;  %p660_p2 = scmp.lt.s32.totalorder %s60_s16, %s60_s16 }
  0x24   :  { %p656_p1 = scmp.ne.s32.totalorder %s60_s16, %s655_s19  ;;  %p661_p3 = scmp.lt.s32.totalorder %s655_s19, %s655_s19 }
  0x26   :  { %p662_p4 = por %p661_p3, %p660_p2 }
  0x28   :  { %p663_p5 = pnand %p662_p4, %p656_p1 }
  0x2a   :  { %666 = shalt.err (!%p663_p5)
}
  0x2b   :  { %62 = dma.hbm_to_vmem [thread:$0]  %s772_s4, 32, %s60_s16, [#allocation10]  }
  0x2c   :  { %687 = dma.done.wait [#allocation4], 256  }
  0x2d   :  { %688 = vsyncadd [#allocation4], 4294967040 }
  0x2e   :  { %689 = dma.done.wait [#allocation7], 4128  }
  0x2f   :  { %690 = vsyncadd [#allocation7], 4294963168 }
  0x30   :  { %691 = dma.done.wait [#allocation10], 32  }
  0x31   :  { %692 = vsyncadd [#allocation10], 4294967264  ;;  %v701_v0 = vmov 0   ;;  %v536_v1 = vld [vmem:[#allocation3 + $0x4] ss:$8 sps:$4 sm:$0xff]   ;;  %vm106_vm0 = vcmask 130048   ;;  %v86_v37 = vlaneseq }
  0x32   :  { %142 = vmatprep.mubr.bf16.mxu0 %v701_v0  ;;  %v538_v2 = vld [vmem:[#allocation3] ss:$8 sps:$4 sm:$0xff]   ;;  %124 = vmatprep.subr.bf16.mxu0 %v536_v1  ;;  %v544_v8 = vld [vmem:[#allocation8 + $0x60] ss:$8 sps:$4 sm:$0xff]   ;;  %v84_v40 = vld [vmem:[#allocation6] sm:$0x3] }
  0x33   :  { %v80_v3 = vld [vmem:[%s768_s0] sm:$0x3]  ;;  %v539_v5 = vld [vmem:[#allocation8 + $0x74] ss:$8 sps:$4 sm:$0xff]   ;;  %v541_v6 = vld [vmem:[#allocation8 + $0x70] ss:$8 sps:$4 sm:$0xff]   ;;  %125 = vmatpush1.bf16.msra.mxu0 %v538_v2 }
  0x34   :  { %v81_v4 = vpack.c.bf16 %v80_v3, %v80_v3  ;;  %v542_v7 = vld [vmem:[#allocation8 + $0x64] ss:$8 sps:$4 sm:$0xff]   ;;  %359 = vmatprep.subr.bf16.mxu1 %v539_v5  ;;  %v545_v9 = vld [vmem:[#allocation8 + $0x54] ss:$8 sps:$4 sm:$0xff]   ;;  %v547_v10 = vld [vmem:[#allocation8 + $0x50] ss:$8 sps:$4 sm:$0xff]  }
  0x35   :  { %360 = vmatpush1.bf16.msra.mxu1 %v541_v6  ;;  %v548_v11 = vld [vmem:[#allocation8 + $0x44] ss:$8 sps:$4 sm:$0xff]   ;;  %v550_v12 = vld [vmem:[#allocation8 + $0x40] ss:$8 sps:$4 sm:$0xff]   ;;  %v551_v13 = vld [vmem:[#allocation8 + $0x34] ss:$8 sps:$4 sm:$0xff]  }
  0x36   :  { %493 = vmatmul.mubr.msk.bf16.vlgmr.msra.gmra.mxu0 %vm106_vm0, %v81_v4  ;;  %361 = vmatprep.subr.bf16.mxu1 %v542_v7  ;;  %v553_v14 = vld [vmem:[#allocation8 + $0x30] ss:$8 sps:$4 sm:$0xff]   ;;  %v554_v15 = vld [vmem:[#allocation8 + $0x24] ss:$8 sps:$4 sm:$0xff]   ;;  %v556_v16 = vld [vmem:[#allocation8 + $0x20] ss:$8 sps:$4 sm:$0xff]  }
  0x37   :  { %v557_v17 = vld [vmem:[#allocation8 + $0x14] ss:$8 sps:$4 sm:$0xff]   ;;  %v559_v18 = vld [vmem:[#allocation8 + $0x10] ss:$8 sps:$4 sm:$0xff]   ;;  %v560_v19 = vld [vmem:[#allocation8 + $0x4] ss:$8 sps:$4 sm:$0xff]  }
  0x38   :  { %v562_v20 = vld [vmem:[#allocation8] ss:$8 sps:$4 sm:$0xff]   ;;  %v563_v21 = vld [vmem:[#allocation8 + $0xf4] ss:$8 sps:$4 sm:$0xff]   ;;  %v565_v22 = vld [vmem:[#allocation8 + $0xf0] ss:$8 sps:$4 sm:$0xff]  }
  0x39   :  { %362 = vmatpush1.bf16.msra.mxu1 %v544_v8  ;;  %v566_v23 = vld [vmem:[#allocation8 + $0xe4] ss:$8 sps:$4 sm:$0xff]   ;;  %v568_v24 = vld [vmem:[#allocation8 + $0xe0] ss:$8 sps:$4 sm:$0xff]   ;;  %v569_v25 = vld [vmem:[#allocation8 + $0xd4] ss:$8 sps:$4 sm:$0xff]  }
  0x3a   :  { %363 = vmatprep.subr.bf16.mxu1 %v545_v9  ;;  %v571_v26 = vld [vmem:[#allocation8 + $0xd0] ss:$8 sps:$4 sm:$0xff]   ;;  %v572_v27 = vld [vmem:[#allocation8 + $0xc4] ss:$8 sps:$4 sm:$0xff]   ;;  %v574_v28 = vld [vmem:[#allocation8 + $0xc0] ss:$8 sps:$4 sm:$0xff]  }
  0x3b   :  { %v575_v29 = vld [vmem:[#allocation8 + $0xb4] ss:$8 sps:$4 sm:$0xff]   ;;  %v577_v30 = vld [vmem:[#allocation8 + $0xb0] ss:$8 sps:$4 sm:$0xff]   ;;  %v578_v31 = vld [vmem:[#allocation8 + $0xa4] ss:$8 sps:$4 sm:$0xff]  }
  0x3c   :  { %v580_v32 = vld [vmem:[#allocation8 + $0xa0] ss:$8 sps:$4 sm:$0xff]   ;;  %v581_v33 = vld [vmem:[#allocation8 + $0x94] ss:$8 sps:$4 sm:$0xff]   ;;  %v583_v34 = vld [vmem:[#allocation8 + $0x90] ss:$8 sps:$4 sm:$0xff]  }
  0x3d   :  { %364 = vmatpush1.bf16.msra.mxu1 %v547_v10  ;;  %v584_v35 = vld [vmem:[#allocation8 + $0x84] ss:$8 sps:$4 sm:$0xff]   ;;  %v586_v36 = vld [vmem:[#allocation8 + $0x80] ss:$8 sps:$4 sm:$0xff]   ;;  %v87_v38 = vshrl.u32 %v86_v37, 7  ;;  %s703_s23 = smov [#allocation11]  }
  0x3e   :  { %365 = vmatprep.subr.bf16.mxu1 %v548_v11  ;;  %v702_v54 = vmov 1966171168   ;;  %v526_v56 = vld.sshfl [vmem:[%s773_s5] sm:$0x11 pattern:$0x75316420]  ;;  %v406_v11 = vstv %s774_s6 }
  0x3f   :  { %v88_v39 = vsub.s32 0, %v87_v38  ;;  %v92_v41 = vsub.s32 1, %v87_v38  ;;  %v417_v55 = vunpack.c.l.s4 %v702_v54  ;;  %v415_v58 = vcombine.high %v526_v56, %v526_v56  ;;  %v187_v62 = vld [vmem:[#allocation9] sm:$0x3]  ;;  %s480_s24 = sshll.u32 %s703_s23, 4  ;;  %s481_s24 = int_to_ptr.vmem [resolvable:$true] %s480_s24 }
  0x40   :  { %vm472_vm1 = vcmask 8192   ;;  %s667_s25 = scalar_lea.vmem %s481_s24, 16  ;;  %s671_s26 = scalar_lea.vmem %s481_s24, 32 }
  0x41   :  { %366 = vmatpush1.bf16.msra.mxu1 %v550_v12  ;;  %v89_v42 = vrot.slane %v84_v40, %v88_v39  ;;  %v93_v43 = vrot.slane %v84_v40, %v92_v41  ;;  %v418_v57 = vunpack.c.0.s8 %v417_v55  ;;  %v192_v63 = vrot.slane %v187_v62, %v88_v39  ;;  %p668_p6 = scmp.ne.s32.totalorder %s481_s24, %s667_s25  ;;  %p672_p7 = scmp.lt.s32.totalorder %s481_s24, %s481_s24 }
  0x42   :  { %367 = vmatprep.subr.bf16.mxu1 %v551_v13  ;;  %v196_v0 = vrot.slane %v187_v62, %v92_v41  ;;  %p673_p8 = scmp.lt.s32.totalorder %s671_s26, %s667_s25 }
  0x43   :  { %v421_v59 = vsub.s32 %v418_v57, %v87_v38 }
  0x44   :  { %p674_p9 = por %p673_p8, %p672_p7 }
  0x45   :  { %368 = vmatpush1.bf16.msra.mxu1 %v553_v14  ;;  %v429_v60 = vrot.slane %v415_v58, %v421_v59  ;;  %v422_v61 = vrot.slane %v526_v56, %v421_v59 }
  0x46   :  { %369 = vmatprep.subr.bf16.mxu1 %v554_v15  ;;  %p675_p10 = pnand %p674_p9, %p668_p6 }
  0x47   :  { %464 = vmatprep.mubr.bf16.mxu0 %v429_v60 }
  0x49   :  { %370 = vmatpush1.bf16.msra.mxu1 %v556_v16 }
  0x4a   :  { %371 = vmatprep.subr.bf16.mxu1 %v557_v17 }
  0x4d   :  { %372 = vmatpush1.bf16.msra.mxu1 %v559_v18 }
  0x4e   :  { %373 = vmatprep.subr.bf16.mxu1 %v560_v19 }
  0x51   :  { %374 = vmatpush1.bf16.msra.mxu1 %v562_v20 }
  0x52   :  { %375 = vmatprep.subr.bf16.mxu1 %v563_v21 }
  0x55   :  { %376 = vmatpush2.bf16.msra.mxu1 %v565_v22 }
  0x56   :  { %377 = vmatprep.subr.bf16.mxu1 %v566_v23 }
  0x59   :  { %378 = vmatpush2.bf16.msra.mxu1 %v568_v24 }
  0x5a   :  { %379 = vmatprep.subr.bf16.mxu1 %v569_v25 }
  0x5d   :  { %380 = vmatpush2.bf16.msra.mxu1 %v571_v26 }
  0x5e   :  { %381 = vmatprep.subr.bf16.mxu1 %v572_v27 }
  0x61   :  { %382 = vmatpush2.bf16.msra.mxu1 %v574_v28 }
  0x62   :  { %383 = vmatprep.subr.bf16.mxu1 %v575_v29 }
  0x65   :  { %384 = vmatpush2.bf16.msra.mxu1 %v577_v30 }
  0x66   :  { %385 = vmatprep.subr.bf16.mxu1 %v578_v31 }
  0x69   :  { %386 = vmatpush2.bf16.msra.mxu1 %v580_v32 }
  0x6a   :  { %387 = vmatprep.subr.bf16.mxu1 %v581_v33 }
  0x6d   :  { %388 = vmatpush2.bf16.msra.mxu1 %v583_v34 }
  0x6e   :  { %389 = vmatprep.subr.bf16.mxu1 %v584_v35 }
  0x71   :  { %390 = vmatpush2.bf16.msra.mxu1 %v586_v36 }
  0xf6   :  { %v144_v44 = vpop.f32.mrf.mxu0 }
  0xf7   :  { %v145_v45 = vadd.f32 %v144_v44, %v89_v42 }
  0xf8   :  { %v146_v46 = vpop.f32.mrf.mxu0 }
  0xf9   :  { %v147_v47 = vadd.f32 %v146_v46, %v93_v43  ;;  %v151_v48 = vmax.f32 %v145_v45, 0.0 }
  0xfa   :  { %v148_v49 = vpop.f32.mrf.mxu0 }
  0xfb   :  { %v152_v50 = vmax.f32 %v147_v47, 0.0  ;;  %v153_v53 = vpack.c.bf16 %v151_v48, %v151_v48 }
  0xfc   :  { %v149_v51 = vpop.f32.mrf.mxu0 }
  0xfd   :  { %v154_v52 = vpack.c.bf16 %v152_v50, %v152_v50 }
  0xff   :  { %391 = vmatprep.mubr.bf16.mxu1 %v154_v52 }
 0x100   :  { %392 = vmatmul.mubr.bf16.vlgmr.msra.gmra.mxu1 %v153_v53 }
 0x1c0   :  { %v393_v1 = vpop.f32.mrf.mxu1 }
 0x1c1   :  { %v394_v2 = vadd.f32 %v393_v1, %v192_v63 }
 0x1c2   :  { %v395_v3 = vpop.f32.mrf.mxu1 }
 0x1c3   :  { %v396_v4 = vadd.f32 %v395_v3, %v196_v0  ;;  %v400_v5 = vmax.f32 %v394_v2, 0.0 }
 0x1c4   :  { %v397_v6 = vpop.f32.mrf.mxu1 }
 0x1c5   :  { %v401_v7 = vmax.f32 %v396_v4, 0.0  ;;  %v402_v10 = vpack.c.bf16 %v400_v5, %v400_v5 }
 0x1c6   :  { %v398_v8 = vpop.f32.mrf.mxu1 }
 0x1c7   :  { %v403_v9 = vpack.c.bf16 %v401_v7, %v401_v7 }
 0x1c9   :  { %446 = vmatprep.subr.bf16.mxu0 %v403_v9 }
 0x1ca   :  { %447 = vmatpush1.bf16.xpose.msra.mxu0 %v402_v10 }
 0x1d1   :  { %465 = vmatmul.mubr.bf16.vlgmr.msra.gmra.mxu0 %v422_v61 }
 0x291   :  { %v466_v12 = vpop.f32.mrf.mxu0 }
 0x292   :  { %v467_v13 = vadd.f32 %v466_v12, %v406_v11 }
 0x293   :  { %v468_v14 = vpop.f32.mrf.mxu0 }
 0x294   :  { %473 = vst.msk [vmem:[#allocation11] sm:$0x1] %vm472_vm1, %v467_v13 }
 0x295   :  { %v469_v15 = vpop.f32.mrf.mxu0 }
 0x296   :  { %678 = shalt.err (!%p675_p10)
}
 0x297   :  { %483 = dma.vmem_to_hbm [thread:$0]  %s481_s24, 16, %s775_s7, [#allocation5]   ;;  %v470_v16 = vpop.f32.mrf.mxu0 }
 0x298   :  { %693 = dma.done.wait [#allocation5], 16  }
 0x299   :  { %694 = vsyncadd [#allocation5], 4294967280 }
 0x29a   :  { %487 = vsyncpa [#allocation4], 1 }
 0x29b   :  { %488 = vsyncpa [#allocation7], 1 }
 0x29c   :  { %489 = vsyncpa [#allocation10], 1 }
 0x29d   :  { %490 = vsyncpa [#allocation5], 1 }

</bundles_post_ra>
